<compile_context>
chip_gen: v5e
topology: v5e:2x2
jax: 0.10.0
libtpu: 0.0.40
codegen_flags: <defaults>
</compile_context>

<pallas_src>
import functools

import jax
import jax.numpy as jnp
from jax.experimental import pallas as pl
from jax.experimental.pallas import tpu as pltpu


def _make_kernel(S, d_model, vocab, TB, compute_dtype):
    def kernel(tok_ref, emb_ref, w12_ref, b12_ref, w3_ref, b3_ref, out_ref):
        # Resident embedding table (constant index_map -> DMA'd once).
        emb = emb_ref[...]                                   # (vocab, d_model)

        acc = jnp.zeros((TB, 16), jnp.float32)
        # Unrolled over the 7 token slots: gather rows via one-hot on the MXU,
        # immediately contract with the matching slice of the folded W12.
        for s in range(S):
            ids = tok_ref[:, s:s + 1]                        # (TB, 1) int32
            onehot = (ids == jax.lax.broadcasted_iota(
                jnp.int32, (TB, vocab), 1)).astype(compute_dtype)   # (TB, vocab)
            rows = jnp.dot(onehot, emb,
                           preferred_element_type=jnp.float32)      # (TB, d_model)
            acc = acc + jnp.dot(
                rows.astype(compute_dtype),
                w12_ref[s * d_model:(s + 1) * d_model, :],
                preferred_element_type=jnp.float32)                 # (TB, 16)

        z2 = jnp.maximum(acc + b12_ref[...], 0.0)            # ReLU(Linear(64,16))
        # Final Linear(16, 1) as a VPU multiply + lane reduction.
        z3 = jnp.sum(z2 * w3_ref[...], axis=-1, keepdims=True) + b3_ref[...]
        out_ref[...] = z3.astype(out_ref.dtype)

    return kernel


@functools.partial(jax.jit, static_argnames=("block_b", "compute_dtype"))
def addition_linear_encoder(tokens, emb_table, w1, b1, w2, b2, w3, b3,
                            *, block_b=None, compute_dtype=jnp.float32):
    """tokens: (B, 7) int32. Returns (B, 1) float32."""
    B, S = tokens.shape
    vocab, d_model = emb_table.shape

    # Fold the two consecutive linear layers (no nonlinearity in between).
    w12 = w1 @ w2                           # (S*d_model, 16)
    b12 = b1 @ w2 + b2                      # (1, 16)
    w3_row = w3.reshape(1, -1)              # (1, 16) row for the VPU reduction

    # Batch tile: multiple of 8 sublanes, capped so the intermediates stay tiny
    # on every generation's VMEM (the fused design never materializes
    # (B, 7*d_model) activations in HBM or VMEM).
    if block_b is None:
        block_b = min(512, max(8, -(-B // 8) * 8))
    TB = block_b
    Bp = -(-B // TB) * TB                   # pad batch up to a multiple of TB
    tokens = tokens.astype(jnp.int32)
    if Bp != B:
        tokens = jnp.pad(tokens, ((0, Bp - B), (0, 0)))  # pad rows use token id 0

    emb_c = emb_table.astype(compute_dtype)
    w12_c = w12.astype(compute_dtype)

    kernel = _make_kernel(S, d_model, vocab, TB, compute_dtype)

    out = pl.pallas_call(
        kernel,
        out_shape=jax.ShapeDtypeStruct((Bp, 1), jnp.float32),
        grid_spec=pltpu.PrefetchScalarGridSpec(
            num_scalar_prefetch=0,
            grid=(Bp // TB,),
            in_specs=[
                pl.BlockSpec((TB, S), lambda i: (i, 0)),            # token tile
                pl.BlockSpec((vocab, d_model), lambda i: (0, 0)),   # emb (resident)
                pl.BlockSpec((S * d_model, 16), lambda i: (0, 0)),  # folded W12
                pl.BlockSpec((1, 16), lambda i: (0, 0)),            # folded b12
                pl.BlockSpec((1, 16), lambda i: (0, 0)),            # w3 row
                pl.BlockSpec((1, 1), lambda i: (0, 0)),             # b3
            ],
            out_specs=pl.BlockSpec((TB, 1), lambda i: (i, 0)),
        ),
        compiler_params=pltpu.CompilerParams(
            dimension_semantics=("parallel",),       # batch tiles are independent
            vmem_limit_bytes=32 * 1024 * 1024,       # ample; footprint is small
        ),
    )(tokens, emb_c, w12_c, b12, w3_row, b3)
    return out[:B]


def init_params(key, vocab_size, d_model):
    """Deterministic, PyTorch-like initialization (shapes from __init__)."""
    ks = jax.random.split(key, 7)
    in1 = d_model * 7

    def lin_init(kw, kb, fan_in, fan_out):
        bound = 1.0 / jnp.sqrt(fan_in)
        w = jax.random.uniform(kw, (fan_in, fan_out), jnp.float32, -bound, bound)
        b = jax.random.uniform(kb, (1, fan_out), jnp.float32, -bound, bound)
        return w, b

    emb_table = jax.random.normal(ks[0], (vocab_size, d_model), jnp.float32)
    w1, b1 = lin_init(ks[1], ks[2], in1, 64)
    w2, b2 = lin_init(ks[3], ks[4], 64, 16)
    w3, b3 = lin_init(ks[5], ks[6], 16, 1)
    return emb_table, w1, b1, w2, b2, w3, b3


if __name__ == "__main__":
    key = jax.random.PRNGKey(0)
    vocab_size = 20
    d_model = 32       # small stand-in for the default 512
    B, S = 10, 7       # forward implies exactly 7 tokens; B=10 exercises padding

    k_tok, k_par = jax.random.split(key)
    tokens = jax.random.randint(k_tok, (B, S), 0, vocab_size, dtype=jnp.int32)
    params = init_params(k_par, vocab_size, d_model)

    out = addition_linear_encoder(tokens, *params)
    out = jax.block_until_ready(out)

    # Pure-JAX reference (unfused, exact module structure).
    emb_table, w1, b1, w2, b2, w3, b3 = params
    h = jnp.take(emb_table, tokens, axis=0).reshape(B, S * d_model)
    ref = h @ w1 + b1
    ref = jnp.maximum(ref @ w2 + b2, 0.0)
    ref = ref @ w3 + b3

    assert out.shape == (B, 1)
    assert jnp.allclose(out, ref, atol=1e-4, rtol=1e-4)

    print("KERNEL_OK")
</pallas_src>

<mosaic_0001>
module attributes {stable_mosaic.version = 11 : i64} {
  func.func @kernel(%arg0: i32, %arg1: memref<16x7xi32, #tpu.memory_space<vmem>>, %arg2: memref<20x32xf32, #tpu.memory_space<vmem>>, %arg3: memref<224x16xf32, #tpu.memory_space<vmem>>, %arg4: memref<1x16xf32, #tpu.memory_space<vmem>>, %arg5: memref<1x16xf32, #tpu.memory_space<vmem>>, %arg6: memref<1x1xf32, #tpu.memory_space<vmem>>, %arg7: memref<16x1xf32, #tpu.memory_space<vmem>>) attributes {dimension_semantics = [#tpu.dimension_semantics<parallel>], iteration_bounds = array<i64: 1>, scalar_prefetch = 0 : i64, scratch_operands = 0 : i64, tpu.core_type = #tpu.core_type<tc>, window_params = [{transform_indices = @transform_0, window_bounds = array<i64: 16, 7>}, {pipeline_mode = #tpu.pipeline_mode<synchronous>, transform_indices = @transform_1, window_bounds = array<i64: 20, 32>}, {pipeline_mode = #tpu.pipeline_mode<synchronous>, transform_indices = @transform_2, window_bounds = array<i64: 224, 16>}, {pipeline_mode = #tpu.pipeline_mode<synchronous>, transform_indices = @transform_3, window_bounds = array<i64: 1, 16>}, {pipeline_mode = #tpu.pipeline_mode<synchronous>, transform_indices = @transform_4, window_bounds = array<i64: 1, 16>}, {pipeline_mode = #tpu.pipeline_mode<synchronous>, transform_indices = @transform_5, window_bounds = array<i64: 1, 1>}, {transform_indices = @transform_6, window_bounds = array<i64: 16, 1>}]} {
    %c0 = arith.constant 0 : index
    %c0_0 = arith.constant 0 : index
    %0 = vector.load %arg2[%c0, %c0_0] : memref<20x32xf32, #tpu.memory_space<vmem>>, vector<20x32xf32>
    %cst = arith.constant 0.000000e+00 : f32
    %1 = vector.broadcast %cst : f32 to vector<16x16xf32>
    %c0_1 = arith.constant 0 : index
    %c0_2 = arith.constant 0 : index
    %2 = vector.load %arg1[%c0_1, %c0_2] : memref<16x7xi32, #tpu.memory_space<vmem>>, vector<16x1xi32>
    %3 = tpu.iota {dimensions = array<i32: 1>} : vector<16x20xi32>
    %4 = vector.broadcast %2 : vector<16x1xi32> to vector<16x20xi32>
    %5 = arith.cmpi eq, %4, %3 : vector<16x20xi32>
    %6 = arith.extui %5 : vector<16x20xi1> to vector<16x20xi32>
    %7 = arith.sitofp %6 : vector<16x20xi32> to vector<16x20xf32>
    %cst_3 = arith.constant dense<0.000000e+00> : vector<16x32xf32>
    %8 = tpu.matmul %7, %0, %cst_3 {dimension_numbers = #tpu.dot_dimension_numbers<[1], [0], [0], [1], [0, 0, 1, 1], [], []>} : vector<16x20xf32>, vector<20x32xf32>, vector<16x32xf32> -> vector<16x32xf32>
    %c0_4 = arith.constant 0 : index
    %c0_5 = arith.constant 0 : index
    %9 = vector.load %arg3[%c0_4, %c0_5] : memref<224x16xf32, #tpu.memory_space<vmem>>, vector<32x16xf32>
    %cst_6 = arith.constant dense<0.000000e+00> : vector<16x16xf32>
    %10 = tpu.matmul %8, %9, %cst_6 {dimension_numbers = #tpu.dot_dimension_numbers<[1], [0], [0], [1], [0, 0, 1, 1], [], []>} : vector<16x32xf32>, vector<32x16xf32>, vector<16x16xf32> -> vector<16x16xf32>
    %11 = arith.addf %1, %10 : vector<16x16xf32>
    %c0_7 = arith.constant 0 : index
    %c1 = arith.constant 1 : index
    %12 = vector.load %arg1[%c0_7, %c1] : memref<16x7xi32, #tpu.memory_space<vmem>>, vector<16x1xi32>
    %13 = tpu.iota {dimensions = array<i32: 1>} : vector<16x20xi32>
    %14 = vector.broadcast %12 : vector<16x1xi32> to vector<16x20xi32>
    %15 = arith.cmpi eq, %14, %13 : vector<16x20xi32>
    %16 = arith.extui %15 : vector<16x20xi1> to vector<16x20xi32>
    %17 = arith.sitofp %16 : vector<16x20xi32> to vector<16x20xf32>
    %cst_8 = arith.constant dense<0.000000e+00> : vector<16x32xf32>
    %18 = tpu.matmul %17, %0, %cst_8 {dimension_numbers = #tpu.dot_dimension_numbers<[1], [0], [0], [1], [0, 0, 1, 1], [], []>} : vector<16x20xf32>, vector<20x32xf32>, vector<16x32xf32> -> vector<16x32xf32>
    %c32 = arith.constant 32 : index
    %c0_9 = arith.constant 0 : index
    %19 = vector.load %arg3[%c32, %c0_9] : memref<224x16xf32, #tpu.memory_space<vmem>>, vector<32x16xf32>
    %cst_10 = arith.constant dense<0.000000e+00> : vector<16x16xf32>
    %20 = tpu.matmul %18, %19, %cst_10 {dimension_numbers = #tpu.dot_dimension_numbers<[1], [0], [0], [1], [0, 0, 1, 1], [], []>} : vector<16x32xf32>, vector<32x16xf32>, vector<16x16xf32> -> vector<16x16xf32>
    %21 = arith.addf %11, %20 : vector<16x16xf32>
    %c0_11 = arith.constant 0 : index
    %c2 = arith.constant 2 : index
    %22 = vector.load %arg1[%c0_11, %c2] : memref<16x7xi32, #tpu.memory_space<vmem>>, vector<16x1xi32>
    %23 = tpu.iota {dimensions = array<i32: 1>} : vector<16x20xi32>
    %24 = vector.broadcast %22 : vector<16x1xi32> to vector<16x20xi32>
    %25 = arith.cmpi eq, %24, %23 : vector<16x20xi32>
    %26 = arith.extui %25 : vector<16x20xi1> to vector<16x20xi32>
    %27 = arith.sitofp %26 : vector<16x20xi32> to vector<16x20xf32>
    %cst_12 = arith.constant dense<0.000000e+00> : vector<16x32xf32>
    %28 = tpu.matmul %27, %0, %cst_12 {dimension_numbers = #tpu.dot_dimension_numbers<[1], [0], [0], [1], [0, 0, 1, 1], [], []>} : vector<16x20xf32>, vector<20x32xf32>, vector<16x32xf32> -> vector<16x32xf32>
    %c64 = arith.constant 64 : index
    %c0_13 = arith.constant 0 : index
    %29 = vector.load %arg3[%c64, %c0_13] : memref<224x16xf32, #tpu.memory_space<vmem>>, vector<32x16xf32>
    %cst_14 = arith.constant dense<0.000000e+00> : vector<16x16xf32>
    %30 = tpu.matmul %28, %29, %cst_14 {dimension_numbers = #tpu.dot_dimension_numbers<[1], [0], [0], [1], [0, 0, 1, 1], [], []>} : vector<16x32xf32>, vector<32x16xf32>, vector<16x16xf32> -> vector<16x16xf32>
    %31 = arith.addf %21, %30 : vector<16x16xf32>
    %c0_15 = arith.constant 0 : index
    %c3 = arith.constant 3 : index
    %32 = vector.load %arg1[%c0_15, %c3] : memref<16x7xi32, #tpu.memory_space<vmem>>, vector<16x1xi32>
    %33 = tpu.iota {dimensions = array<i32: 1>} : vector<16x20xi32>
    %34 = vector.broadcast %32 : vector<16x1xi32> to vector<16x20xi32>
    %35 = arith.cmpi eq, %34, %33 : vector<16x20xi32>
    %36 = arith.extui %35 : vector<16x20xi1> to vector<16x20xi32>
    %37 = arith.sitofp %36 : vector<16x20xi32> to vector<16x20xf32>
    %cst_16 = arith.constant dense<0.000000e+00> : vector<16x32xf32>
    %38 = tpu.matmul %37, %0, %cst_16 {dimension_numbers = #tpu.dot_dimension_numbers<[1], [0], [0], [1], [0, 0, 1, 1], [], []>} : vector<16x20xf32>, vector<20x32xf32>, vector<16x32xf32> -> vector<16x32xf32>
    %c96 = arith.constant 96 : index
    %c0_17 = arith.constant 0 : index
    %39 = vector.load %arg3[%c96, %c0_17] : memref<224x16xf32, #tpu.memory_space<vmem>>, vector<32x16xf32>
    %cst_18 = arith.constant dense<0.000000e+00> : vector<16x16xf32>
    %40 = tpu.matmul %38, %39, %cst_18 {dimension_numbers = #tpu.dot_dimension_numbers<[1], [0], [0], [1], [0, 0, 1, 1], [], []>} : vector<16x32xf32>, vector<32x16xf32>, vector<16x16xf32> -> vector<16x16xf32>
    %41 = arith.addf %31, %40 : vector<16x16xf32>
    %c0_19 = arith.constant 0 : index
    %c4 = arith.constant 4 : index
    %42 = vector.load %arg1[%c0_19, %c4] : memref<16x7xi32, #tpu.memory_space<vmem>>, vector<16x1xi32>
    %43 = tpu.iota {dimensions = array<i32: 1>} : vector<16x20xi32>
    %44 = vector.broadcast %42 : vector<16x1xi32> to vector<16x20xi32>
    %45 = arith.cmpi eq, %44, %43 : vector<16x20xi32>
    %46 = arith.extui %45 : vector<16x20xi1> to vector<16x20xi32>
    %47 = arith.sitofp %46 : vector<16x20xi32> to vector<16x20xf32>
    %cst_20 = arith.constant dense<0.000000e+00> : vector<16x32xf32>
    %48 = tpu.matmul %47, %0, %cst_20 {dimension_numbers = #tpu.dot_dimension_numbers<[1], [0], [0], [1], [0, 0, 1, 1], [], []>} : vector<16x20xf32>, vector<20x32xf32>, vector<16x32xf32> -> vector<16x32xf32>
    %c128 = arith.constant 128 : index
    %c0_21 = arith.constant 0 : index
    %49 = vector.load %arg3[%c128, %c0_21] : memref<224x16xf32, #tpu.memory_space<vmem>>, vector<32x16xf32>
    %cst_22 = arith.constant dense<0.000000e+00> : vector<16x16xf32>
    %50 = tpu.matmul %48, %49, %cst_22 {dimension_numbers = #tpu.dot_dimension_numbers<[1], [0], [0], [1], [0, 0, 1, 1], [], []>} : vector<16x32xf32>, vector<32x16xf32>, vector<16x16xf32> -> vector<16x16xf32>
    %51 = arith.addf %41, %50 : vector<16x16xf32>
    %c0_23 = arith.constant 0 : index
    %c5 = arith.constant 5 : index
    %52 = vector.load %arg1[%c0_23, %c5] : memref<16x7xi32, #tpu.memory_space<vmem>>, vector<16x1xi32>
    %53 = tpu.iota {dimensions = array<i32: 1>} : vector<16x20xi32>
    %54 = vector.broadcast %52 : vector<16x1xi32> to vector<16x20xi32>
    %55 = arith.cmpi eq, %54, %53 : vector<16x20xi32>
    %56 = arith.extui %55 : vector<16x20xi1> to vector<16x20xi32>
    %57 = arith.sitofp %56 : vector<16x20xi32> to vector<16x20xf32>
    %cst_24 = arith.constant dense<0.000000e+00> : vector<16x32xf32>
    %58 = tpu.matmul %57, %0, %cst_24 {dimension_numbers = #tpu.dot_dimension_numbers<[1], [0], [0], [1], [0, 0, 1, 1], [], []>} : vector<16x20xf32>, vector<20x32xf32>, vector<16x32xf32> -> vector<16x32xf32>
    %c160 = arith.constant 160 : index
    %c0_25 = arith.constant 0 : index
    %59 = vector.load %arg3[%c160, %c0_25] : memref<224x16xf32, #tpu.memory_space<vmem>>, vector<32x16xf32>
    %cst_26 = arith.constant dense<0.000000e+00> : vector<16x16xf32>
    %60 = tpu.matmul %58, %59, %cst_26 {dimension_numbers = #tpu.dot_dimension_numbers<[1], [0], [0], [1], [0, 0, 1, 1], [], []>} : vector<16x32xf32>, vector<32x16xf32>, vector<16x16xf32> -> vector<16x16xf32>
    %61 = arith.addf %51, %60 : vector<16x16xf32>
    %c0_27 = arith.constant 0 : index
    %c6 = arith.constant 6 : index
    %62 = vector.load %arg1[%c0_27, %c6] : memref<16x7xi32, #tpu.memory_space<vmem>>, vector<16x1xi32>
    %63 = tpu.iota {dimensions = array<i32: 1>} : vector<16x20xi32>
    %64 = vector.broadcast %62 : vector<16x1xi32> to vector<16x20xi32>
    %65 = arith.cmpi eq, %64, %63 : vector<16x20xi32>
    %66 = arith.extui %65 : vector<16x20xi1> to vector<16x20xi32>
    %67 = arith.sitofp %66 : vector<16x20xi32> to vector<16x20xf32>
    %cst_28 = arith.constant dense<0.000000e+00> : vector<16x32xf32>
    %68 = tpu.matmul %67, %0, %cst_28 {dimension_numbers = #tpu.dot_dimension_numbers<[1], [0], [0], [1], [0, 0, 1, 1], [], []>} : vector<16x20xf32>, vector<20x32xf32>, vector<16x32xf32> -> vector<16x32xf32>
    %c192 = arith.constant 192 : index
    %c0_29 = arith.constant 0 : index
    %69 = vector.load %arg3[%c192, %c0_29] : memref<224x16xf32, #tpu.memory_space<vmem>>, vector<32x16xf32>
    %cst_30 = arith.constant dense<0.000000e+00> : vector<16x16xf32>
    %70 = tpu.matmul %68, %69, %cst_30 {dimension_numbers = #tpu.dot_dimension_numbers<[1], [0], [0], [1], [0, 0, 1, 1], [], []>} : vector<16x32xf32>, vector<32x16xf32>, vector<16x16xf32> -> vector<16x16xf32>
    %71 = arith.addf %61, %70 : vector<16x16xf32>
    %c0_31 = arith.constant 0 : index
    %c0_32 = arith.constant 0 : index
    %72 = vector.load %arg4[%c0_31, %c0_32] : memref<1x16xf32, #tpu.memory_space<vmem>>, vector<1x16xf32>
    %73 = vector.broadcast %72 : vector<1x16xf32> to vector<16x16xf32>
    %74 = arith.addf %71, %73 : vector<16x16xf32>
    %cst_33 = arith.constant 0.000000e+00 : f32
    %75 = vector.broadcast %cst_33 : f32 to vector<16x16xf32>
    %76 = arith.maximumf %74, %75 : vector<16x16xf32>
    %c0_34 = arith.constant 0 : index
    %c0_35 = arith.constant 0 : index
    %77 = vector.load %arg5[%c0_34, %c0_35] : memref<1x16xf32, #tpu.memory_space<vmem>>, vector<1x16xf32>
    %78 = vector.broadcast %77 : vector<1x16xf32> to vector<16x16xf32>
    %79 = arith.mulf %76, %78 : vector<16x16xf32>
    %cst_36 = arith.constant dense<0.000000e+00> : vector<16xf32>
    %80 = vector.multi_reduction <add>, %79, %cst_36 [1] : vector<16x16xf32> to vector<16xf32>
    %81 = vector.shape_cast %80 : vector<16xf32> to vector<16x1xf32>
    %c0_37 = arith.constant 0 : index
    %c0_38 = arith.constant 0 : index
    %82 = vector.load %arg6[%c0_37, %c0_38] : memref<1x1xf32, #tpu.memory_space<vmem>>, vector<1x1xf32>
    %83 = vector.broadcast %82 : vector<1x1xf32> to vector<16x1xf32>
    %84 = arith.addf %81, %83 : vector<16x1xf32>
    %c0_39 = arith.constant 0 : index
    %c0_40 = arith.constant 0 : index
    %85 = vector.load %arg7[%c0_39, %c0_40] : memref<16x1xf32, #tpu.memory_space<vmem>>, vector<16x1xf32>
    tpu.vector_store %arg7[%c0_39, %c0_40], %84 {strides = array<i32>} : memref<16x1xf32, #tpu.memory_space<vmem>>, vector<16x1xf32>,
    return
  }
  func.func @transform_0(%arg0: i32) -> (i32, i32) {
    %c0_i32 = arith.constant 0 : i32
    %c0_i32_0 = arith.constant 0 : i32
    return %arg0, %c0_i32 : i32, i32
  }
  func.func @transform_1(%arg0: i32) -> (i32, i32) {
    %c0_i32 = arith.constant 0 : i32
    %c0_i32_0 = arith.constant 0 : i32
    %c0_i32_1 = arith.constant 0 : i32
    return %c0_i32, %c0_i32_0 : i32, i32
  }
  func.func @transform_2(%arg0: i32) -> (i32, i32) {
    %c0_i32 = arith.constant 0 : i32
    %c0_i32_0 = arith.constant 0 : i32
    %c0_i32_1 = arith.constant 0 : i32
    return %c0_i32, %c0_i32_0 : i32, i32
  }
  func.func @transform_3(%arg0: i32) -> (i32, i32) {
    %c0_i32 = arith.constant 0 : i32
    %c0_i32_0 = arith.constant 0 : i32
    %c0_i32_1 = arith.constant 0 : i32
    return %c0_i32, %c0_i32_0 : i32, i32
  }
  func.func @transform_4(%arg0: i32) -> (i32, i32) {
    %c0_i32 = arith.constant 0 : i32
    %c0_i32_0 = arith.constant 0 : i32
    %c0_i32_1 = arith.constant 0 : i32
    return %c0_i32, %c0_i32_0 : i32, i32
  }
  func.func @transform_5(%arg0: i32) -> (i32, i32) {
    %c0_i32 = arith.constant 0 : i32
    %c0_i32_0 = arith.constant 0 : i32
    %c0_i32_1 = arith.constant 0 : i32
    return %c0_i32, %c0_i32_0 : i32, i32
  }
  func.func @transform_6(%arg0: i32) -> (i32, i32) {
    %c0_i32 = arith.constant 0 : i32
    %c0_i32_0 = arith.constant 0 : i32
    return %arg0, %c0_i32 : i32, i32
  }
}

</mosaic_0001>

<bundles_post_ra>
// kernel: addition_linear_encoder.1
= control target key start
LH: loop header
LB: loop body
LE: loop exit
PB: predicated region body
PF: predicated region fallthrough
CT: control target
= control target key end

     0   :  { %vm51_vm0 = vcmask 1043456   ;;  %v678_v0 = vmov 1   ;;  %v679_v1 = vmov 0   ;;  %v680_v6 = vmov 2   ;;  %s953_s0 = inlined_call_operand.vmem [shape: s32[16,7], index: 0, kind: input, shape index: {}]   ;;  %s954_s1 = inlined_call_operand.vmem [shape: f32[20,32], index: 1, kind: input, shape index: {}]   ;;  %s955_s2 = inlined_call_operand.vmem [shape: f32[224,16], index: 2, kind: input, shape index: {}]   ;;  %s956_s3 = inlined_call_operand.vmem [shape: f32[1,16], index: 3, kind: input, shape index: {}]   ;;  %s957_s4 = inlined_call_operand.vmem [shape: f32[1,16], index: 4, kind: input, shape index: {}]   ;;  %s958_s5 = inlined_call_operand.<no memory space> [shape: f32[1,1], index: 5, kind: input, shape index: {}]   ;;  %s959_s6 = inlined_call_operand.vmem [shape: f32[16,1], index: 6, kind: output, shape index: {}]  }
   0x1   :  { %663 = vset.pattern.permute.xlu0 %v678_v0  ;;  %664 = vset.pattern.permute.xlu1 %v679_v1  ;;  %v724_v2 = vld [vmem:[%s953_s0 + $0x8] sm:$0xff]  ;;  %v729_v3 = vld [vmem:[%s953_s0] sm:$0xff]  ;;  %v734_v4 = vld [vmem:[%s954_s1 + $0x10] sm:$0xf]  ;;  %v30_v8 = vlaneseq  ;;  %v681_v10 = vmov 3   ;;  %v682_v13 = vmov 5  }
   0x2   :  { %36 = vperm.xlu1 %664, %v724_v2   ;;  %83 = vperm.xlu0 %663, %v729_v3   ;;  %v741_v5 = vld [vmem:[%s954_s1 + $0x8] sm:$0xff]  ;;  %v762_v7 = vld [vmem:[%s954_s1] sm:$0xff]  ;;  %v126_v9 = vld [vmem:[%s955_s2 + $0x38] sm:$0xff]  ;;  %vm44_vm1 = vcmask 162816   ;;  %v683_v17 = vmov 0.0   ;;  %v684_v20 = vmov 4  }
   0x3   :  { %665 = vset.pattern.permute.xlu2 %v680_v6  ;;  %607 = vmatpush.msk.msra.mxu1 %vm51_vm0, %v734_v4  ;;  %v775_v11 = vand.u32 127, %v30_v8  ;;  %v125_v12 = vld [vmem:[%s955_s2 + $0x30] sm:$0xff]  ;;  %v124_v14 = vld [vmem:[%s955_s2 + $0x28] sm:$0xff]  ;;  %v685_v21 = vmov 6   ;;  %v123_v30 = vld [vmem:[%s955_s2 + $0x20] sm:$0xff]  ;;  %vm127_vm9 = vcmask 261120  }
   0x4   :  { %187 = vperm.xlu2 %665, %v729_v3   ;;  %602 = vmatpush.msk.msra.mxu0 %vm51_vm0, %v734_v4  ;;  %v81_v31 = vld [vmem:[%s955_s2 + $0x18] sm:$0xff]  ;;  %v80_v32 = vld [vmem:[%s955_s2 + $0x10] sm:$0xff]  ;;  %v79_v33 = vld [vmem:[%s955_s2 + $0x8] sm:$0xff] }
   0x5   :  { %114 = vmatpush.msra.mxu1 %v741_v5  ;;  %652 = vmatpush.msk.msra.mxu3 %vm51_vm0, %v734_v4  ;;  %v78_v34 = vld [vmem:[%s955_s2] sm:$0xff]  ;;  %v230_v35 = vld [vmem:[%s955_s2 + $0x58] sm:$0xff]  ;;  %v229_v36 = vld [vmem:[%s955_s2 + $0x50] sm:$0xff] }
   0x6   :  { %649 = vmatpush.msk.msra.mxu2 %vm51_vm0, %v734_v4  ;;  %69 = vmatpush.msra.mxu0 %v741_v5  ;;  %v228_v37 = vld [vmem:[%s955_s2 + $0x48] sm:$0xff]  ;;  %v227_v38 = vld [vmem:[%s955_s2 + $0x40] sm:$0xff]  ;;  %v306_v61 = vld [vmem:[%s955_s2 + $0x78] sm:$0xff] }
   0x7   :  { %653 = vmatpush.msra.mxu3 %v741_v5  ;;  %115 = vmatpush.msra.mxu1 %v762_v7  ;;  %v305_v62 = vld [vmem:[%s955_s2 + $0x70] sm:$0xff]  ;;  %v304_v63 = vld [vmem:[%s955_s2 + $0x68] sm:$0xff]  ;;  %v382_v0 = vld [vmem:[%s955_s2 + $0x98] sm:$0xff] }
   0x8   :  { %650 = vmatpush.msra.mxu2 %v741_v5  ;;  %70 = vmatpush.msra.mxu0 %v762_v7  ;;  %v381_v1 = vld [vmem:[%s955_s2 + $0x90] sm:$0xff] }
   0x9   :  { %654 = vmatpush.msra.mxu3 %v762_v7  ;;  %249 = vmatpush.msrb.mxu1 %v230_v35 }
   0xa   :  { %33 = vperm.xlu1 %664, %v729_v3   ;;  %86 = vperm.xlu0 %663, %v724_v2  }
   0xb   :  { %651 = vmatpush.msra.mxu2 %v762_v7  ;;  %616 = vmatpush.msk.msrb.mxu0 %vm51_vm0, %v734_v4 }
   0xc   :  { %666 = vset.pattern.permute.xlu2 %v681_v10  ;;  %175 = vmatpush.msrb.mxu3 %v81_v31 }
   0xd   :  { %218 = vmatpush.msrb.mxu0 %v741_v5  ;;  %263 = vperm.xlu2 %666, %v729_v3  }
   0xe   :  { %146 = vmatpush.msrb.mxu2 %v126_v9  ;;  %176 = vmatpush.msrb.mxu3 %v80_v32  ;;  %v456_v9 = vld [vmem:[%s955_s2 + $0xa8] sm:$0xff] }
   0xf   :  { %219 = vmatpush.msrb.mxu0 %v762_v7  ;;  %250 = vmatpush.msrb.mxu1 %v229_v36 }
  0x10   :  { %147 = vmatpush.msrb.mxu2 %v125_v12  ;;  %177 = vmatpush.msrb.mxu3 %v79_v33  ;;  %v533_v12 = vld [vmem:[%s955_s2 + $0xd0] sm:$0xff] }
  0x11   :  { %251 = vmatpush.msrb.mxu1 %v228_v37 }
  0x12   :  { %667 = vset.pattern.permute.xlu0 %v680_v6  ;;  %668 = vset.pattern.permute.xlu1 %v681_v10  ;;  %v458_v6 = vld [vmem:[%s955_s2 + $0xb8] sm:$0xff] }
  0x13   :  { %190 = vperm.xlu0 %667, %v724_v2   ;;  %266 = vperm.xlu1 %668, %v724_v2   ;;  %v534_v10 = vld [vmem:[%s955_s2 + $0xd8] sm:$0xff] }
  0x14   :  { %148 = vmatpush.msrb.mxu2 %v124_v14  ;;  %178 = vmatpush.msrb.mxu3 %v78_v34  ;;  %v532_v14 = vld [vmem:[%s955_s2 + $0xc8] sm:$0xff] }
  0x15   :  { %669 = vset.pattern.permute.xlu2 %v684_v20  ;;  %252 = vmatpush.msrb.mxu1 %v227_v38 }
  0x16   :  { %339 = vperm.xlu2 %669, %v729_v3   ;;  %149 = vmatpush.msrb.mxu2 %v123_v30 }
  0x1b   :  { %671 = vset.pattern.permute.xlu0 %v682_v13  ;;  %670 = vset.pattern.permute.xlu1 %v682_v13 }
  0x1c   :  { %418 = vperm.xlu0 %671, %v724_v2   ;;  %415 = vperm.xlu1 %670, %v729_v3  }
  0x1e   :  { %342 = vperm.xlu2 %669, %v724_v2  }
  0x24   :  { %674 = vset.pattern.permute.xlu0 %v685_v21  ;;  %672 = vset.pattern.permute.xlu1 %v685_v21 }
  0x25   :  { %491 = vperm.xlu1 %672, %v729_v3   ;;  %v380_v3 = vld [vmem:[%s955_s2 + $0x88] sm:$0xff] }
  0x26   :  { %673 = vset.pattern.permute.xlu2 %v685_v21 }
  0x27   :  { %494 = vperm.xlu2 %673, %v724_v2   ;;  %v303_v2 = vld [vmem:[%s955_s2 + $0x60] sm:$0xff] }
  0x5e   :  { %v188_v26 = vpop.permute.xlu2 %187 }
  0x5f   :  { %vm192_vm6 = vcmp.eq.s32.totalorder %v188_v26, %v775_v11 }
  0x60   :  { %v614_v27 = vsel %vm192_vm6, 1.0, %v683_v17 }
  0x67   :  { %v264_v39 = vpop.permute.xlu2 %263 }
  0x68   :  { %vm268_vm12 = vcmp.eq.s32.totalorder %v264_v39, %v775_v11 }
  0x69   :  { %v621_v54 = vsel %vm268_vm12, 1.0, %v683_v17 }
  0x70   :  { %v340_v40 = vpop.permute.xlu2 %339 }
  0x71   :  { %vm344_vm8 = vcmp.eq.s32.totalorder %v340_v40, %v775_v11 }
  0x72   :  { %v628_v41 = vsel %vm344_vm8, 1.0, %v683_v17 }
  0x74   :  { %v37_v15 = vpop.permute.xlu1 %36  ;;  %v84_v16 = vpop.permute.xlu0 %83 }
  0x75   :  { %vm39_vm2 = vcmp.eq.s32.totalorder %v37_v15, %v775_v11  ;;  %vm88_vm3 = vcmp.eq.s32.totalorder %v84_v16, %v775_v11  ;;  %v531_v15 = vld [vmem:[%s955_s2 + $0xc0] sm:$0xff] }
  0x76   :  { %v601_v18 = vsel %vm39_vm2, 1.0, %v683_v17  ;;  %v605_v19 = vsel %vm88_vm3, 1.0, %v683_v17  ;;  %vm593_vm2 = vcmask 7168  }
  0x77   :  { %608 = vmatmul.msk.f32.vlgmr.msra.gmra.mxu1 %vm44_vm1, %v605_v19  ;;  %604 = vmatmul.msk.f32.vlgmr.msra.gmra.mxu2 %vm44_vm1, %v601_v18 }
  0x78   :  { %623 = vmatpush.msk.msra.mxu2 %vm51_vm0, %v734_v4  ;;  %v343_v44 = vpop.permute.xlu2 %342  ;;  %401 = vmatpush.msra.mxu1 %v382_v0 }
  0x79   :  { %vm345_vm10 = vcmp.eq.s32.totalorder %v343_v44, %v775_v11 }
  0x7a   :  { %294 = vmatpush.msra.mxu2 %v741_v5  ;;  %v629_v45 = vsel %vm345_vm10, 1.0, %v683_v17  ;;  %402 = vmatpush.msra.mxu1 %v381_v1 }
  0x7c   :  { %v34_v22 = vpop.permute.xlu1 %33  ;;  %v87_v23 = vpop.permute.xlu0 %86  ;;  %295 = vmatpush.msra.mxu2 %v762_v7  ;;  %403 = vmatpush.msra.mxu1 %v380_v3 }
  0x7d   :  { %vm38_vm4 = vcmp.eq.s32.totalorder %v34_v22, %v775_v11  ;;  %vm89_vm5 = vcmp.eq.s32.totalorder %v87_v23, %v775_v11 }
  0x7e   :  { %v600_v24 = vsel %vm38_vm4, 1.0, %v683_v17  ;;  %v606_v25 = vsel %vm89_vm5, 1.0, %v683_v17 }
  0x7f   :  { %603 = vmatmul.msk.f32.vlgmr.msra.gmra.mxu0 %vm44_vm1, %v600_v24  ;;  %609 = vmatmul.msk.f32.vlgmr.msra.gmra.mxu3 %vm44_vm1, %v606_v25 }
  0x80   :  { %630 = vmatpush.msk.msra.mxu0 %vm51_vm0, %v734_v4  ;;  %325 = vmatpush.msra.mxu3 %v306_v61 }
  0x81   :  { %v495_v53 = vpop.permute.xlu2 %494 }
  0x82   :  { %370 = vmatpush.msra.mxu0 %v741_v5  ;;  %vm497_vm13 = vcmp.eq.s32.totalorder %v495_v53, %v775_v11  ;;  %326 = vmatpush.msra.mxu3 %v305_v62 }
  0x83   :  { %v643_v55 = vsel %vm497_vm13, 1.0, %v683_v17 }
  0x84   :  { %371 = vmatpush.msra.mxu0 %v762_v7  ;;  %327 = vmatpush.msra.mxu3 %v304_v63 }
  0x85   :  { %v191_v28 = vpop.permute.xlu0 %190  ;;  %v267_v42 = vpop.permute.xlu1 %266 }
  0x86   :  { %vm193_vm7 = vcmp.eq.s32.totalorder %v191_v28, %v775_v11  ;;  %vm269_vm14 = vcmp.eq.s32.totalorder %v267_v42, %v775_v11  ;;  %328 = vmatpush.msra.mxu3 %v303_v2 }
  0x87   :  { %617 = vmatmul.msk.f32.vlgmr.msrb.gmra.mxu0 %vm44_vm1, %v614_v27  ;;  %v615_v29 = vsel %vm193_vm7, 1.0, %v683_v17  ;;  %v622_v57 = vsel %vm269_vm14, 1.0, %v683_v17 }
  0x88   :  { %644 = vmatpush.msk.msrb.mxu0 %vm51_vm0, %v734_v4 }
  0x8a   :  { %522 = vmatpush.msrb.mxu0 %v741_v5 }
  0x8c   :  { %523 = vmatpush.msrb.mxu0 %v762_v7 }
  0x8e   :  { %v416_v46 = vpop.permute.xlu1 %415  ;;  %v419_v59 = vpop.permute.xlu0 %418 }
  0x8f   :  { %618 = vmatmul.msk.f32.gmra.mxu0 %vm44_vm1, %v615_v29  ;;  %vm420_vm15 = vcmp.eq.s32.totalorder %v416_v46, %v775_v11  ;;  %v11_v29 = vstv %s958_s5 }
  0x90   :  { %v635_v58 = vsel %vm420_vm15, 1.0, %v683_v17  ;;  %12 = vst [vmem:[#allocation2] sm:$0x1] %v11_v29 }
  0x97   :  { %631 = vmatmul.msk.f32.vlgmr.msra.gmra.mxu0 %vm44_vm1, %v628_v41  ;;  %v492_v50 = vpop.permute.xlu1 %491  ;;  %v675_v41 = vld [vmem:[%s956_s3] ss:$0 sm:$0xff] }
  0x98   :  { %vm496_vm11 = vcmp.eq.s32.totalorder %v492_v50, %v775_v11 }
  0x99   :  { %v642_v52 = vsel %vm496_vm11, 1.0, %v683_v17 }
  0x9f   :  { %632 = vmatmul.msk.f32.gmra.mxu0 %vm44_vm1, %v629_v45  ;;  %v676_v45 = vld [vmem:[%s957_s4] ss:$0 sm:$0xff] }
  0xa7   :  { %645 = vmatmul.msk.f32.vlgmr.msrb.gmra.mxu0 %vm44_vm1, %v642_v52 }
  0xaf   :  { %646 = vmatmul.msk.f32.gmra.mxu0 %vm44_vm1, %v643_v55 }
  0xf4   :  { %v117_v43 = vpop.f32.mrf.mxu1 }
  0xf5   :  { %610 = vmatmul.msk.f32.vlgmr.msrb.gmra.mxu2 %vm127_vm9, %v117_v43 }
  0xf6   :  { %637 = vmatpush.msk.msrb.mxu2 %vm51_vm0, %v734_v4  ;;  %vm421_vm0 = vcmp.eq.s32.totalorder %v419_v59, %v775_v11  ;;  %v379_v4 = vld [vmem:[%s955_s2 + $0x80] sm:$0xff] }
  0xf7   :  { %v636_v60 = vsel %vm421_vm0, 1.0, %v683_v17  ;;  %404 = vmatpush.msra.mxu1 %v379_v4  ;;  %v455_v11 = vld [vmem:[%s955_s2 + $0xa0] sm:$0xff] }
  0xf8   :  { %446 = vmatpush.msrb.mxu2 %v741_v5 }
  0xfa   :  { %447 = vmatpush.msrb.mxu2 %v762_v7  ;;  %v75_v49 = vpop.f32.mrf.mxu2  ;;  %v457_v7 = vld [vmem:[%s955_s2 + $0xb0] sm:$0xff] }
  0xfc   :  { %v72_v47 = vpop.f32.mrf.mxu0 }
  0xfd   :  { %612 = vmatmul.msk.f32.vlgmr.msrb.gmra.mxu3 %vm127_vm9, %v72_v47 }
  0xfe   :  { %477 = vmatpush.msrb.mxu3 %v458_v6 }
 0x100   :  { %478 = vmatpush.msrb.mxu3 %v457_v7 }
 0x102   :  { %v120_v48 = vpop.f32.mrf.mxu3  ;;  %479 = vmatpush.msrb.mxu3 %v456_v9 }
 0x103   :  { %611 = vmatmul.msk.f32.gmra.mxu2 %vm127_vm9, %v120_v48 }
 0x104   :  { %v221_v51 = vpop.f32.mrf.mxu0  ;;  %480 = vmatpush.msrb.mxu3 %v455_v11 }
 0x105   :  { %613 = vmatmul.msk.f32.gmra.mxu3 %vm127_vm9, %v75_v49  ;;  %619 = vmatmul.msk.f32.vlgmr.msrb.gmra.mxu1 %vm127_vm9, %v221_v51 }
 0x106   :  { %553 = vmatpush.msrb.mxu1 %v534_v10 }
 0x108   :  { %554 = vmatpush.msrb.mxu1 %v533_v12 }
 0x10a   :  { %555 = vmatpush.msrb.mxu1 %v532_v14 }
 0x10b   :  { %624 = vmatmul.msk.f32.vlgmr.msra.gmra.mxu2 %vm44_vm1, %v621_v54 }
 0x10c   :  { %v224_v56 = vpop.f32.mrf.mxu0  ;;  %556 = vmatpush.msrb.mxu1 %v531_v15 }
 0x10d   :  { %620 = vmatmul.msk.f32.gmra.mxu1 %vm127_vm9, %v224_v56 }
 0x113   :  { %625 = vmatmul.msk.f32.gmra.mxu2 %vm44_vm1, %v622_v57 }
 0x114   :  { %v373_v5 = vpop.f32.mrf.mxu0 }
 0x115   :  { %633 = vmatmul.msk.f32.vlgmr.msra.gmra.mxu1 %vm127_vm9, %v373_v5 }
 0x11b   :  { %638 = vmatmul.msk.f32.vlgmr.msrb.gmra.mxu2 %vm44_vm1, %v635_v58  ;;  %v677_v58 = vld [vmem:[#allocation2] ss:$0 sm:$0xff] }
 0x11c   :  { %v376_v8 = vpop.f32.mrf.mxu0 }
 0x11d   :  { %634 = vmatmul.msk.f32.gmra.mxu1 %vm127_vm9, %v376_v8 }
 0x123   :  { %639 = vmatmul.msk.f32.gmra.mxu2 %vm44_vm1, %v636_v60  ;;  %vm580_vm1 = vcmask 130048  }
 0x124   :  { %v525_v17 = vpop.f32.mrf.mxu0 }
 0x125   :  { %647 = vmatmul.msk.f32.vlgmr.msrb.gmra.mxu1 %vm127_vm9, %v525_v17 }
 0x12c   :  { %v528_v19 = vpop.f32.mrf.mxu0 }
 0x12d   :  { %648 = vmatmul.msk.f32.gmra.mxu1 %vm127_vm9, %v528_v19 }
 0x178   :  { %v151_v13 = vpop.f32.mrf.mxu2 }
 0x180   :  { %v180_v24 = vpop.f32.mrf.mxu3 }
 0x181   :  { %v181_v30 = vadd.f32 %v180_v24, %v151_v13 }
 0x182   :  { %v254_v23 = vpop.f32.mrf.mxu1 }
 0x183   :  { %v260_v33 = vadd.f32 %v254_v23, %v181_v30 }
 0x186   :  { %v154_v16 = vpop.f32.mrf.mxu2 }
 0x188   :  { %v183_v26 = vpop.f32.mrf.mxu3 }
 0x189   :  { %v184_v35 = vadd.f32 %v183_v26, %v154_v16 }
 0x18a   :  { %v257_v25 = vpop.f32.mrf.mxu1 }
 0x18b   :  { %v261_v39 = vadd.f32 %v257_v25, %v184_v35 }
 0x18e   :  { %v297_v18 = vpop.f32.mrf.mxu2 }
 0x18f   :  { %626 = vmatmul.msk.f32.vlgmr.msra.gmra.mxu3 %vm127_vm9, %v297_v18 }
 0x192   :  { %v406_v27 = vpop.f32.mrf.mxu1 }
 0x196   :  { %v300_v20 = vpop.f32.mrf.mxu2 }
 0x197   :  { %627 = vmatmul.msk.f32.gmra.mxu3 %vm127_vm9, %v300_v20 }
 0x19a   :  { %v409_v31 = vpop.f32.mrf.mxu1 }
 0x19e   :  { %v449_v21 = vpop.f32.mrf.mxu2 }
 0x19f   :  { %640 = vmatmul.msk.f32.vlgmr.msrb.gmra.mxu3 %vm127_vm9, %v449_v21 }
 0x1a2   :  { %v558_v36 = vpop.f32.mrf.mxu1 }
 0x1a6   :  { %v452_v22 = vpop.f32.mrf.mxu2 }
 0x1a7   :  { %641 = vmatmul.msk.f32.gmra.mxu3 %vm127_vm9, %v452_v22 }
 0x1aa   :  { %v561_v49 = vpop.f32.mrf.mxu1 }
 0x212   :  { %v330_v28 = vpop.f32.mrf.mxu3 }
 0x213   :  { %v336_v34 = vadd.f32 %v330_v28, %v260_v33 }
 0x215   :  { %v412_v37 = vadd.f32 %v406_v27, %v336_v34 }
 0x21a   :  { %v333_v32 = vpop.f32.mrf.mxu3 }
 0x21b   :  { %v337_v42 = vadd.f32 %v333_v32, %v261_v39 }
 0x21d   :  { %v413_v47 = vadd.f32 %v409_v31, %v337_v42 }
 0x222   :  { %v482_v38 = vpop.f32.mrf.mxu3 }
 0x223   :  { %v488_v40 = vadd.f32 %v482_v38, %v412_v37 }
 0x225   :  { %v564_v43 = vadd.f32 %v558_v36, %v488_v40 }
 0x227   :  { %v570_v44 = vadd.f32 %v675_v41, %v564_v43 }
 0x229   :  { %v572_v46 = vmax.f32 %v570_v44, 0.0 }
 0x22a   :  { %v485_v48 = vpop.f32.mrf.mxu3 }
 0x22b   :  { %v489_v50 = vadd.f32 %v485_v48, %v413_v47  ;;  %v578_v51 = vmul.f32 %v676_v45, %v572_v46 }
 0x22d   :  { %v565_v52 = vadd.f32 %v561_v49, %v489_v50  ;;  %v581_v53 = vsel %vm580_vm1, %v578_v51, 0.0 }
 0x22e   :  { %582 = vadd.xlane.f32.xlu1 %v581_v53 }
 0x22f   :  { %v571_v54 = vadd.f32 %v675_v41, %v565_v52 }
 0x231   :  { %v573_v55 = vmax.f32 %v571_v54, 0.0 }
 0x233   :  { %v579_v56 = vmul.f32 %v676_v45, %v573_v55 }
 0x235   :  { %v584_v57 = vsel %vm580_vm1, %v579_v56, 0.0 }
 0x236   :  { %585 = vadd.xlane.f32.xlu2 %v584_v57 }
 0x2a1   :  { %v583_v59 = vpop.xlane.xlu1 %582 }
 0x2a2   :  { %v591_v60 = vadd.f32 %v677_v58, %v583_v59 }
 0x2a4   :  { %594 = vst.msk [vmem:[%s959_s6] sm:$0xff] %vm593_vm2, %v591_v60 }
 0x2a9   :  { %v586_v61 = vpop.xlane.xlu2 %585 }
 0x2aa   :  { %v592_v62 = vadd.f32 %v677_v58, %v586_v61 }
 0x2ac   :  { %595 = vst.msk [vmem:[%s959_s6 + $0x8] sm:$0xff] %vm593_vm2, %v592_v62 }

</bundles_post_ra>
